<compile_context>
chip_gen: v7x
topology: tpu7x:2x2x1
jax: 0.10.0
libtpu: 0.0.40
codegen_flags: <defaults>
</compile_context>

<pallas_src>
import functools

import jax
import jax.numpy as jnp
from jax.experimental import pallas as pl
from jax.experimental.pallas import tpu as pltpu


_ROW_TILE_CAP = 16384        # rows per step; amortizes ~0.35 us/step overhead
_MIN_ROWS_FOR_SPLIT = 256    # keep >= this many rows per tile before splitting C
_NEG_PAD = -1e30             # column padding value (exp underflows to 0)


def _round_up(x, m):
    return ((x + m - 1) // m) * m


def _vmem_budget():
    """Generation-aware (limit, working-set budget) in bytes."""
    cap = 64 << 20                       # conservative default (v7x per-TC VMEM)
    try:
        info = pltpu.get_tpu_info()
        v = getattr(info, "vmem_capacity_bytes", None)
        if v:
            cap = int(v)
    except Exception:
        pass
    # Leave ~16 MiB headroom for compiler-internal scratch; clamp to sane range.
    limit = min(max(cap - (16 << 20), 32 << 20), 96 << 20)
    return limit, limit // 2


def _pick_tiles(n, c, itemsize, budget):
    """Pick (tile_m, tile_c) so double-buffered inputs + f32 temporaries fit."""
    f32_temps = 20  # ~5 live f32/i32 (TM, TC) temporaries (upcast/exp/iota/mask/sel)

    def per_row(tc, with_acc):
        b = tc * (2 * itemsize + f32_temps)
        b += 2 * 2 * 512            # lane-padded (TM,1) targets + output, 2 bufs each
        if with_acc:
            b += 3 * 512            # lane-padded f32 (TM,1) online-softmax scratch
        return b

    # ---- class (lane) tile: split only when a full-C tile with >= 256 rows no
    # longer fits the working-set budget (vocab-sized C).
    if per_row(c, False) * min(_MIN_ROWS_FOR_SPLIT, max(n, 8)) <= budget:
        tc, split = c, False
    else:
        tc_max = budget // (_MIN_ROWS_FOR_SPLIT * (2 * itemsize + f32_temps))
        tc_max = max(128, (tc_max // 128) * 128)
        num_col = -(-c // tc_max)
        tc = _round_up(-(-c // num_col), 128)
        split = tc < c
        if not split:
            tc = c

    # ---- row (sublane) tile: as big as the budget allows, capped & aligned.
    align = 128 if n >= 128 else 8
    tm = budget // per_row(tc, split)
    tm = max(align, min(tm, _ROW_TILE_CAP))
    tm = (tm // align) * align
    tm = min(tm, _round_up(n, align))

    # ---- keep the row-grid step count even (v7x: 2 TensorCores share the
    # "parallel" axis) whenever the batch can be split.
    n_pad_rows = _round_up(n, align)
    steps = -(-n_pad_rows // tm)
    if steps % 2 == 1 and n_pad_rows > align:
        steps += 1
        tm = max(align, _round_up(-(-n_pad_rows // steps), align))
    return tm, tc


def _gce_single_pass_kernel(logits_ref, tgt_ref, loss_ref, *, q):
    # logits_ref: (TM, C) native dtype, tgt_ref: (TM, 1) i32, loss_ref: (TM, 1) f32.
    x = logits_ref[...].astype(jnp.float32)                     # (TM, C)
    tgt = tgt_ref[...]                                          # (TM, 1)
    tm, c = x.shape

    m = jnp.max(x, axis=-1, keepdims=True)                      # (TM, 1)
    z = x - m                                                   # (TM, C)
    sumexp = jnp.sum(jnp.exp(z), axis=-1, keepdims=True)        # (TM, 1)

    # Target-class shifted logit via one-hot masked reduce (no per-row dynamic
    # gather on TPU; masked lane-reduce is the idiom).
    cls_idx = jax.lax.broadcasted_iota(jnp.int32, (tm, c), 1)   # (TM, C)
    z_t = jnp.sum(jnp.where(cls_idx == tgt, z, 0.0),
                  axis=-1, keepdims=True)                       # (TM, 1)

    log_p_t = z_t - jnp.log(sumexp)                             # log softmax @ target
    ce = -log_p_t                                               # CE, reduction='none'
    # loss_weight = p_t**q * q, as exp(q * log p_t) * q (single EUP transcendental).
    weight = jnp.exp(q * log_p_t) * q
    # TODO(synk): PyTorch detaches this weight (.detach()); a custom_vjp with
    # stop_gradient on `weight` is required before using this for training.
    loss_ref[...] = ce * weight


def _gce_online_kernel(logits_ref, tgt_ref, loss_ref, m_sc, s_sc, xt_sc, *, q):
    # Class axis is tiled: online-softmax accumulation across k = program_id(1).
    k = pl.program_id(1)
    nk = pl.num_programs(1)

    @pl.when(k == 0)
    def _():
        m_sc[...] = jnp.full_like(m_sc, -jnp.inf)
        s_sc[...] = jnp.zeros_like(s_sc)
        xt_sc[...] = jnp.zeros_like(xt_sc)

    x = logits_ref[...].astype(jnp.float32)                     # (TM, TC)
    tgt = tgt_ref[...]                                          # (TM, 1)
    tm, tc = x.shape

    m_prev = m_sc[...]
    m_new = jnp.maximum(m_prev, jnp.max(x, axis=-1, keepdims=True))
    corr = jnp.exp(m_prev - m_new)
    s_sc[...] = s_sc[...] * corr + jnp.sum(jnp.exp(x - m_new),
                                           axis=-1, keepdims=True)
    m_sc[...] = m_new

    cls_idx = jax.lax.broadcasted_iota(jnp.int32, (tm, tc), 1) + k * tc
    xt_sc[...] = xt_sc[...] + jnp.sum(jnp.where(cls_idx == tgt, x, 0.0),
                                      axis=-1, keepdims=True)

    @pl.when(k == nk - 1)
    def _():
        log_p_t = (xt_sc[...] - m_sc[...]) - jnp.log(s_sc[...])
        ce = -log_p_t
        weight = jnp.exp(q * log_p_t) * q
        # TODO(synk): same .detach() caveat as the single-pass kernel.
        loss_ref[...] = ce * weight


def generalized_ce_loss(logits, targets, *, q=0.7, reduction="mean",
                        tile_m=None, tile_c=None):
    assert reduction in ("none", "mean", "sum")
    n, c = logits.shape
    itemsize = jnp.dtype(logits.dtype).itemsize

    vmem_limit, tile_budget = _vmem_budget()
    tm, tc = _pick_tiles(n, c, itemsize, tile_budget)
    if tile_m is not None:
        tm = tile_m
    if tile_c is not None:
        tc = tile_c
    assert tm % 8 == 0
    assert tc == c or tc % 128 == 0

    num_row_tiles = -(-n // tm)
    n_pad = num_row_tiles * tm
    c_pad = _round_up(c, tc)
    num_col_tiles = c_pad // tc

    targets_2d = targets.astype(jnp.int32).reshape(n, 1)
    if c_pad != c:
        # Pad classes with a large negative value: exp underflows to 0, never max,
        # and never matches a (valid, < C) target index.
        logits = jnp.pad(logits, ((0, 0), (0, c_pad - c)),
                         constant_values=_NEG_PAD)
    if n_pad != n:
        logits = jnp.pad(logits, ((0, n_pad - n), (0, 0)))
        targets_2d = jnp.pad(targets_2d, ((0, n_pad - n), (0, 0)))
    # TODO(synk): out-of-range targets silently give z_t = 0 instead of erroring
    # like torch.gather / F.cross_entropy.

    cost = pl.CostEstimate(
        flops=5 * n_pad * c_pad,
        transcendentals=n_pad * (c_pad + 2 + num_col_tiles),
        bytes_accessed=n_pad * c_pad * itemsize + n_pad * 4 + n_pad * 4,
    )

    if num_col_tiles == 1:
        kernel = functools.partial(_gce_single_pass_kernel, q=q)
        grid = (num_row_tiles,)
        in_specs = [pl.BlockSpec((tm, c_pad), lambda i: (i, 0)),
                    pl.BlockSpec((tm, 1), lambda i: (i, 0))]
        out_specs = pl.BlockSpec((tm, 1), lambda i: (i, 0))
        scratch = []
        dim_sem = ("parallel",)
    else:
        kernel = functools.partial(_gce_online_kernel, q=q)
        grid = (num_row_tiles, num_col_tiles)
        in_specs = [pl.BlockSpec((tm, tc), lambda i, k: (i, k)),
                    pl.BlockSpec((tm, 1), lambda i, k: (i, 0))]
        out_specs = pl.BlockSpec((tm, 1), lambda i, k: (i, 0))
        scratch = [pltpu.VMEM((tm, 1), jnp.float32) for _ in range(3)]
        dim_sem = ("parallel", "arbitrary")

    per_ex = pl.pallas_call(
        kernel,
        out_shape=jax.ShapeDtypeStruct((n_pad, 1), jnp.float32),
        grid_spec=pltpu.PrefetchScalarGridSpec(
            num_scalar_prefetch=0,
            grid=grid,
            in_specs=in_specs,
            out_specs=out_specs,
            scratch_shapes=tuple(scratch)),
        compiler_params=pltpu.CompilerParams(
            dimension_semantics=dim_sem,
            vmem_limit_bytes=vmem_limit),
        cost_estimate=cost,
    )(logits, targets_2d)

    loss = per_ex.reshape(-1)[:n]
    if reduction == "mean":
        return loss.mean()
    elif reduction == "sum":
        return loss.sum()
    return loss
    # TODO(synk): the PyTorch module's host-side NaN checks (raise NameError on
    # nan softmax / Yg) have no in-kernel equivalent and are omitted.


def _reference_gce(logits, targets, q=0.7, reduction="mean"):
    logp = jax.nn.log_softmax(logits.astype(jnp.float32), axis=1)
    logp_t = jnp.take_along_axis(logp, targets[:, None], axis=1)[:, 0]
    ce = -logp_t
    yg = jnp.exp(logp_t)
    loss = ce * (yg ** q) * q
    if reduction == "mean":
        return loss.mean()
    elif reduction == "sum":
        return loss.sum()
    return loss


if __name__ == "__main__":
    key = jax.random.PRNGKey(0)
    k_logits, k_tgt = jax.random.split(key)

    # Small shapes consistent with the module: batch=16, num_classes=32.
    N, C = 16, 32
    logits = jax.random.normal(k_logits, (N, C), dtype=jnp.float32)
    targets = jax.random.randint(k_tgt, (N,), 0, C, dtype=jnp.int32)
    loss = jax.block_until_ready(
        generalized_ce_loss(logits, targets, q=0.7, reduction="mean"))
    ref = _reference_gce(logits, targets, q=0.7, reduction="mean")
    assert jnp.allclose(loss, ref, rtol=1e-5, atol=1e-5), (loss, ref)

    # Padded-tail path: non-multiple batch, bf16 logits in native dtype, 'none'.
    N2 = 13
    logits2 = jax.random.normal(k_logits, (N2, C), dtype=jnp.bfloat16)
    targets2 = jax.random.randint(k_tgt, (N2,), 0, C, dtype=jnp.int32)
    per_ex = jax.block_until_ready(
        generalized_ce_loss(logits2, targets2, q=0.7, reduction="none"))
    ref2 = _reference_gce(logits2, targets2, q=0.7, reduction="none")
    assert per_ex.shape == (N2,)
    assert jnp.allclose(per_ex, ref2, rtol=1e-4, atol=1e-4), (per_ex, ref2)

    # Class-split (online-softmax) path exercised at small scale by forcing a
    # 128-wide class tile (C=200 padded to 256 -> two column steps).
    N3, C3 = 64, 200
    logits3 = jax.random.normal(k_logits, (N3, C3), dtype=jnp.float32)
    targets3 = jax.random.randint(k_tgt, (N3,), 0, C3, dtype=jnp.int32)
    out3 = jax.block_until_ready(
        generalized_ce_loss(logits3, targets3, q=0.7, reduction="sum", tile_c=128))
    ref3 = _reference_gce(logits3, targets3, q=0.7, reduction="sum")
    assert jnp.allclose(out3, ref3, rtol=2e-4, atol=1e-3), (out3, ref3)

    print("KERNEL_OK")
</pallas_src>

<mosaic_0001>
module attributes {stable_mosaic.version = 11 : i64} {
  func.func @_gce_single_pass_kernel(%arg0: i32, %arg1: memref<8x32xf32, #tpu.memory_space<vmem>>, %arg2: memref<8x1xi32, #tpu.memory_space<vmem>>, %arg3: memref<8x1xf32, #tpu.memory_space<vmem>>) attributes {dimension_semantics = [#tpu.dimension_semantics<parallel>], iteration_bounds = array<i64: 2>, scalar_prefetch = 0 : i64, scratch_operands = 0 : i64, tpu.core_type = #tpu.core_type<tc>, window_params = [{transform_indices = @transform_0, window_bounds = array<i64: 8, 32>}, {transform_indices = @transform_1, window_bounds = array<i64: 8, 1>}, {transform_indices = @transform_2, window_bounds = array<i64: 8, 1>}]} {
    %c0 = arith.constant 0 : index
    %c0_0 = arith.constant 0 : index
    %0 = vector.load %arg1[%c0, %c0_0] : memref<8x32xf32, #tpu.memory_space<vmem>>, vector<8x32xf32>
    %c0_1 = arith.constant 0 : index
    %c0_2 = arith.constant 0 : index
    %1 = vector.load %arg2[%c0_1, %c0_2] : memref<8x1xi32, #tpu.memory_space<vmem>>, vector<8x1xi32>
    %cst = arith.constant dense<0xFF800000> : vector<8xf32>
    %2 = vector.multi_reduction <maximumf>, %0, %cst [1] : vector<8x32xf32> to vector<8xf32>
    %3 = vector.shape_cast %2 : vector<8xf32> to vector<8x1xf32>
    %4 = vector.broadcast %3 : vector<8x1xf32> to vector<8x32xf32>
    %5 = arith.subf %0, %4 : vector<8x32xf32>
    %6 = math.exp %5 : vector<8x32xf32>
    %cst_3 = arith.constant dense<0.000000e+00> : vector<8xf32>
    %7 = vector.multi_reduction <add>, %6, %cst_3 [1] : vector<8x32xf32> to vector<8xf32>
    %8 = vector.shape_cast %7 : vector<8xf32> to vector<8x1xf32>
    %9 = tpu.iota {dimensions = array<i32: 1>} : vector<8x32xi32>
    %10 = vector.broadcast %1 : vector<8x1xi32> to vector<8x32xi32>
    %11 = arith.cmpi eq, %9, %10 : vector<8x32xi32>
    %cst_4 = arith.constant 0.000000e+00 : f32
    %12 = vector.broadcast %cst_4 : f32 to vector<8x32xf32>
    %13 = arith.select %11, %5, %12 : vector<8x32xi1>, vector<8x32xf32>
    %cst_5 = arith.constant dense<0.000000e+00> : vector<8xf32>
    %14 = vector.multi_reduction <add>, %13, %cst_5 [1] : vector<8x32xf32> to vector<8xf32>
    %15 = vector.shape_cast %14 : vector<8xf32> to vector<8x1xf32>
    %16 = math.log %8 : vector<8x1xf32>
    %17 = arith.subf %15, %16 : vector<8x1xf32>
    %cst_6 = arith.constant 0.000000e+00 : f32
    %18 = vector.broadcast %cst_6 : f32 to vector<8x1xf32>
    %19 = arith.subf %18, %17 : vector<8x1xf32>
    %cst_7 = arith.constant 0.699999988 : f32
    %20 = vector.broadcast %cst_7 : f32 to vector<8x1xf32>
    %21 = arith.mulf %20, %17 : vector<8x1xf32>
    %22 = math.exp %21 : vector<8x1xf32>
    %cst_8 = arith.constant 0.699999988 : f32
    %23 = vector.broadcast %cst_8 : f32 to vector<8x1xf32>
    %24 = arith.mulf %22, %23 : vector<8x1xf32>
    %25 = arith.mulf %19, %24 : vector<8x1xf32>
    %c0_9 = arith.constant 0 : index
    %c0_10 = arith.constant 0 : index
    %26 = vector.load %arg3[%c0_9, %c0_10] : memref<8x1xf32, #tpu.memory_space<vmem>>, vector<8x1xf32>
    tpu.vector_store %arg3[%c0_9, %c0_10], %25 {strides = array<i32>} : memref<8x1xf32, #tpu.memory_space<vmem>>, vector<8x1xf32>,
    return
  }
  func.func @transform_0(%arg0: i32) -> (i32, i32) {
    %c0_i32 = arith.constant 0 : i32
    %c0_i32_0 = arith.constant 0 : i32
    return %arg0, %c0_i32 : i32, i32
  }
  func.func @transform_1(%arg0: i32) -> (i32, i32) {
    %c0_i32 = arith.constant 0 : i32
    %c0_i32_0 = arith.constant 0 : i32
    return %arg0, %c0_i32 : i32, i32
  }
  func.func @transform_2(%arg0: i32) -> (i32, i32) {
    %c0_i32 = arith.constant 0 : i32
    %c0_i32_0 = arith.constant 0 : i32
    return %arg0, %c0_i32 : i32, i32
  }
}

</mosaic_0001>

<bundles_post_ra>
// kernel: tpu_custom_call.1
= control target key start
LH: loop header
LB: loop body
LE: loop exit
PB: predicated region body
PF: predicated region fallthrough
CT: control target
= control target key end

     0   :  { %s304_s9 = smov 0   ;;  %s332_s0 = inlined_call_operand.vmem [shape: f32[16,32], index: 0, kind: input, shape index: {}]   ;;  %s333_s1 = inlined_call_operand.vmem [shape: s32[16,1], index: 1, kind: input, shape index: {}]   ;;  %s334_s2 = inlined_call_operand.vmem [shape: f32[16,1], index: 2, kind: output, shape index: {}]  }
   0x1 LB: > { %s254_s10 = sadd.s32 4294967295, %s286_s9   ;;  %p258_p0 = scmp.ge.s32.totalorder %s286_s9, 1  ;;  %s286_s9 = sphi %s304_s9, %s12_s9  }
   0x2   : > { %p120_p1 = scmp.lt.s32.totalorder %s286_s9, 3 }
   0x4   : > { %p121_p2 = pnand %p258_p0, %p120_p1 }
   0x5   : > { %p144_p3 = scmp.lt.s32.totalorder (!%p121_p2), %s254_s10, 1  ;;  %v288_v0 = vmov (!%p121_p2), 0   ;;  %vm158_vm0 = vcmask (!%p121_p2), 261120   ;;  %v168_v7 = vlaneseq (!%p121_p2)  ;;  %vm187_vm2 = vcmask (!%p121_p2), 7168  }
   0x6   : > { %124 = sbr.rel (%p121_p2) target bundleno = 353 (0x161), region = 28  ;;  %273 = vset.pattern.permute.xlu0 (!%p121_p2), %v288_v0 }
   0x7   : > { %v169_v8 = vand.u32 (!%p121_p2), 127, %v168_v7 }
   0xd   : > { %s336_s10 = smov (!%p144_p3, %s254_s10), 1 }
   0xe   : > { %s312_s11 = sshll.u32 %s336_s10, 3 }
   0xf   : > { %s147_s14 = scalar_lea.vmem %s332_s0, %s312_s11  ;;  %s151_s17 = scalar_lea.vmem %s333_s1, %s312_s11 }
  0x10   : > { %v156_v1 = vld [vmem:[%s147_s14] sm:$0xff]  ;;  %s155_s20 = scalar_lea.vmem %s334_s2, %s312_s11 }
  0x11   : > { %v159_v2 = vsel %vm158_vm0, %v156_v1, -inf  ;;  %v157_v3 = vld [vmem:[%s151_s17] sm:$0xff] }
  0x12   : > { %160 = vmax.xlane.f32.xlu0 %v159_v2 }
  0x28   : > { %171 = vperm.xlu0 %273, %v157_v3  }
  0x9f   : > { %v161_v4 = vpop.xlane.xlu0 %160 }
  0xa0   : > { %v162_v5 = vsub.f32 %v156_v1, %v161_v4 }
  0xa2   : > { %v163_v6 = vmul.f32 1.442695, %v162_v5 }
  0xa4   : > { %274 = vpow2.f32 %v163_v6 }
  0xa7   : > { %v172_v9 = vpop.permute.xlu0 %171 }
  0xa8   : > { %vm173_vm1 = vcmp.eq.s32.totalorder %v169_v8, %v172_v9 }
  0xa9   : > { %v174_v12 = vsel %vm173_vm1, %v162_v5, 0.0 }
  0xaa   : > { %v175_v13 = vsel %vm158_vm0, %v174_v12, 0.0 }
  0xae   : > { %v275_v10 = vpop.eup %274 }
  0xaf   : > { %v165_v11 = vsel %vm158_vm0, %v275_v10, 0.0 }
  0xb0   : > { %166 = vadd.xlane.f32.xlu1 %v165_v11 }
  0xb4   : > { %176 = vadd.xlane.f32.xlu1 %v175_v13 }
 0x13d   : > { %v167_v14 = vpop.xlane.xlu1 %166 }
 0x13e   : > { %276 = vlog2.f32 %v167_v14 }
 0x141   : > { %v177_v17 = vpop.xlane.xlu1 %176 }
 0x148   : > { %v277_v15 = vpop.eup %276 }
 0x149   : > { %v179_v16 = vmul.f32 0.6931472, %v277_v15 }
 0x14b   : > { %v180_v18 = vsub.f32 %v177_v17, %v179_v16 }
 0x14d   : > { %v182_v19 = vmul.f32 0.7, %v180_v18  ;;  %v181_v22 = vsub.f32 0.0, %v180_v18 }
 0x14f   : > { %v183_v20 = vmul.f32 1.442695, %v182_v19 }
 0x151   : > { %278 = vpow2.f32 %v183_v20 }
 0x15b   : > { %v279_v21 = vpop.eup %278 }
 0x15c   : > { %v185_v23 = vmul.f32 0.7, %v279_v21 }
 0x15e   : > { %v186_v24 = vmul.f32 %v185_v23, %v181_v22 }
 0x160   : > { %188 = vst.msk [vmem:[%s155_s20] sm:$0xff] %vm187_vm2, %v186_v24 }
 0x161 PF: > { %s12_s9 = sadd.s32 1, %s286_s9  }
 0x162   : > { %p9_p4 = scmp.ge.s32.totalorder %s12_s9, 4  }
 0x164   :  { %11 = sbr.rel (!%p9_p4) target bundleno = 1 (0x1), region = 61 }

</bundles_post_ra>
